<compile_context>
chip_gen: v5e
topology: v5e:2x2
jax: 0.10.0
libtpu: 0.0.40
codegen_flags: <defaults>
</compile_context>

<pallas_src>
import jax
import jax.numpy as jnp
from jax import lax
from jax.experimental import pallas as pl
from jax.experimental.pallas import tpu as pltpu

NEG_SLOPE = 0.01  # nn.LeakyReLU default negative_slope


def mlp_exp_kernel(x_ref, w1_ref, b1_ref, w2_ref, b2_ref, o_ref):
    # x_ref: (tb, D)   w1_ref: (H, D)   b1_ref: (H, 1)
    # w2_ref: (H, O)   b2_ref: (O, 1)   o_ref: (O, tb)
    x = x_ref[...]
    # First layer on the MXU: contract D of both operands -> (H, tb).  Mosaic performs the
    # (tb, D) -> (D, tb) flip in-kernel (XLU, hidden under the DMA); batch stays on lanes.
    h = lax.dot_general(
        w1_ref[...], x,
        dimension_numbers=(((1,), (1,)), ((), ())),
        preferred_element_type=jnp.float32,
    ) + b1_ref[...]
    h = jnp.where(h >= 0, h, NEG_SLOPE * h)  # LeakyReLU, lane-dense VPU op

    if o_ref.shape[0] == 1:
        # O == 1: replace the N=1 MXU pass with a VPU multiply + sublane reduce.
        y = jnp.sum(w2_ref[...] * h, axis=0, keepdims=True) + b2_ref[...]      # (1, tb)
    else:
        # General O: contract the hidden dim without materializing a transpose of h.
        y = lax.dot_general(
            w2_ref[...], h,
            dimension_numbers=(((0,), (0,)), ((), ())),
            preferred_element_type=jnp.float32,
        ) + b2_ref[...]                                                         # (O, tb)

    o_ref[...] = jnp.exp(y)  # torch.exp(rate_logit): lane-dense EUP + store


def _round_up(n, m):
    return ((n + m - 1) // m) * m


def _chip_profile():
    """Best-effort chip probe -> (tile_budget_bytes, vmem_limit_bytes, prefer_even_steps).

    Falls back to v7x-sized (smallest-VMEM) assumptions if the probe fails, which is safe on
    every generation."""
    vmem_cap = None
    kind = ""
    try:
        vmem_cap = int(pltpu.get_tpu_info().vmem_capacity_bytes)
    except Exception:
        vmem_cap = None
    try:
        kind = jax.devices()[0].device_kind.lower()
    except Exception:
        pass
    is_v7 = ("v7" in kind) or ("7x" in kind)
    if vmem_cap is None:
        vmem_cap = 64 << 20                      # assume the smallest per-core VMEM (v7x)
    if is_v7:
        vmem_cap = min(vmem_cap, 64 << 20)       # v7x VMEM is per-TensorCore
    # v7x has 2 TensorCores per chip -> an even number of "parallel" grid steps keeps
    # megacore balanced; single-TC chips (v5e/v6e) just want the fewest steps that fit.
    prefer_even_steps = is_v7 or vmem_cap <= (64 << 20)
    # Raise the scoped-VMEM limit above the 16/32 MiB defaults (needed on v5e/v5e-sized
    # defaults for big tiles), leaving headroom for compiler-internal scratch.
    vmem_limit = max(32 << 20, vmem_cap - (16 << 20))
    tile_budget = vmem_limit - (4 << 20)
    return tile_budget, vmem_limit, prefer_even_steps


def _per_elem_vmem_bytes(D, H, O, x_itemsize):
    """Approximate VMEM bytes per batch element: double-buffered input/output tiles plus the
    kernel's f32 temporaries (loaded x tile, x^T, hidden activations, logits)."""
    lane = lambda n: _round_up(n, 128)
    sub = lambda n: _round_up(n, 8)
    x_tiles = 2 * lane(D) * x_itemsize           # (tb, D) input window, double-buffered
    out_tiles = 2 * sub(O) * 4                   # (O, tb) output window, double-buffered
    scratch = lane(D) * x_itemsize + (sub(D) + 3 * sub(H) + 2 * sub(O)) * 4
    return x_tiles + out_tiles + scratch


def _pick_tiling(B, per_elem_bytes, tile_budget_bytes, prefer_even_steps):
    """Choose (tb, steps): the fewest, fattest 128-aligned batch tiles that fit the VMEM
    budget; on 2-TC chips prefer an even (>=2) step count so megacore stays balanced."""
    max_tb = max(128, (tile_budget_bytes // per_elem_bytes) // 128 * 128)
    steps = pl.cdiv(B, max_tb)                   # fewest steps the VMEM budget allows
    if prefer_even_steps:
        steps = max(steps, 2)
        if steps % 2:
            steps += 1
        steps = min(steps, max(1, pl.cdiv(B, 128)))   # never shrink tiles below 128 lanes
    tb = min(max_tb, _round_up(pl.cdiv(B, steps), 128))
    steps = pl.cdiv(B, tb)
    return tb, steps


def exponential_model_forward(x, w1, b1, w2, b2, *, tb=None):
    """Forward pass of Exponential_Model.

    x : (B, D) float32 (or bfloat16 to halve streamed bytes; accumulation stays f32)
    w1: (H, D)  b1: (H,)   w2: (O, H)  b2: (O,)     (PyTorch nn.Linear layout)
    returns (B, O) float32 = exp(LeakyReLU(x @ w1.T + b1) @ w2.T + b2)
    """
    B, D = x.shape
    H = w1.shape[0]
    O = w2.shape[0]

    tile_budget, vmem_limit, prefer_even_steps = _chip_profile()
    if tb is None:
        tb, steps = _pick_tiling(B, _per_elem_vmem_bytes(D, H, O, x.dtype.itemsize),
                                 tile_budget, prefer_even_steps)
    else:
        tb = max(128, _round_up(tb, 128))
        steps = pl.cdiv(B, tb)

    # Tiny weights are re-laid-out once (negligible) so the kernel is lane-dense in batch.
    w1f = w1.astype(jnp.float32)                 # (H, D), PyTorch layout
    b1c = b1.reshape(H, 1).astype(jnp.float32)   # broadcasts over lanes inside the kernel
    w2c = w2.T.astype(jnp.float32)               # (H, O)
    b2c = b2.reshape(O, 1).astype(jnp.float32)   # (O, 1)

    # The ragged last tile (B % tb != 0) is handled by Pallas' masked block loads/stores, so
    # no padding copy of x is made in HBM and there is no tb=B VMEM cliff.
    # Low-priority perf note: b1/w2/b2 could be folded into one small VMEM block (or SMEM)
    # to save a couple of per-step DMA descriptors; intentionally skipped (marginal).
    outT = pl.pallas_call(
        mlp_exp_kernel,
        out_shape=jax.ShapeDtypeStruct((O, B), jnp.float32),
        grid_spec=pltpu.PrefetchScalarGridSpec(
            num_scalar_prefetch=0,
            grid=(steps,),
            in_specs=[
                pl.BlockSpec((tb, D), lambda i: (i, 0)),   # contiguous batch tile of x
                pl.BlockSpec((H, D), lambda i: (0, 0)),    # W1 (resident)
                pl.BlockSpec((H, 1), lambda i: (0, 0)),    # b1 column
                pl.BlockSpec((H, O), lambda i: (0, 0)),    # W2^T
                pl.BlockSpec((O, 1), lambda i: (0, 0)),    # b2
            ],
            out_specs=pl.BlockSpec((O, tb), lambda i: (0, i)),  # lane-dense output store
        ),
        compiler_params=pltpu.CompilerParams(
            dimension_semantics=("parallel",),    # batch tiles shard across TCs on v7x
            vmem_limit_bytes=int(vmem_limit),
        ),
    )(x, w1f, b1c, w2c, b2c)

    if O == 1:
        return outT.reshape(B, 1)   # free reshape; avoids an XLA transpose of (1, B)
    return outT.T


def reference_forward(x, w1, b1, w2, b2):
    h = x.astype(jnp.float32) @ w1.T + b1
    h = jnp.where(h >= 0, h, NEG_SLOPE * h)
    return jnp.exp(h @ w2.T + b2)


if __name__ == "__main__":
    # Exponential_Model(input_dim=16, hidden_layers=[10], output_dim=1)
    batch, input_dim, hidden, output_dim = 256, 16, 10, 1

    key = jax.random.PRNGKey(0)
    kx, kw1, kb1, kw2, kb2 = jax.random.split(key, 5)

    # Deterministic init mirroring nn.Linear's U(-1/sqrt(fan_in), 1/sqrt(fan_in)).
    bound1 = 1.0 / jnp.sqrt(input_dim)
    bound2 = 1.0 / jnp.sqrt(hidden)
    x = jax.random.normal(kx, (batch, input_dim), dtype=jnp.float32)
    w1 = jax.random.uniform(kw1, (hidden, input_dim), jnp.float32, -bound1, bound1)
    b1 = jax.random.uniform(kb1, (hidden,), jnp.float32, -bound1, bound1)
    w2 = jax.random.uniform(kw2, (output_dim, hidden), jnp.float32, -bound2, bound2)
    b2 = jax.random.uniform(kb2, (output_dim,), jnp.float32, -bound2, bound2)

    # Main path: B divisible by 128.
    out = jax.block_until_ready(exponential_model_forward(x, w1, b1, w2, b2))
    ref = reference_forward(x, w1, b1, w2, b2)
    assert out.shape == (batch, output_dim)
    assert jnp.allclose(out, ref, rtol=1e-5, atol=1e-5), "mismatch vs JAX reference (even B)"

    # Ragged path: B not a multiple of 128 -> masked last tile (no padding copy, no VMEM cliff).
    x_odd = jax.random.normal(kx, (300, input_dim), dtype=jnp.float32)
    out_odd = jax.block_until_ready(exponential_model_forward(x_odd, w1, b1, w2, b2))
    ref_odd = reference_forward(x_odd, w1, b1, w2, b2)
    assert out_odd.shape == (300, output_dim)
    assert jnp.allclose(out_odd, ref_odd, rtol=1e-5, atol=1e-5), "mismatch vs JAX reference (ragged B)"

    print("KERNEL_OK")
</pallas_src>

<mosaic_0001>
module attributes {stable_mosaic.version = 11 : i64} {
  func.func @mlp_exp_kernel(%arg0: i32, %arg1: memref<128x16xf32, #tpu.memory_space<vmem>>, %arg2: memref<10x16xf32, #tpu.memory_space<vmem>>, %arg3: memref<10x1xf32, #tpu.memory_space<vmem>>, %arg4: memref<10x1xf32, #tpu.memory_space<vmem>>, %arg5: memref<1x1xf32, #tpu.memory_space<vmem>>, %arg6: memref<1x128xf32, #tpu.memory_space<vmem>>) attributes {dimension_semantics = [#tpu.dimension_semantics<parallel>], iteration_bounds = array<i64: 2>, scalar_prefetch = 0 : i64, scratch_operands = 0 : i64, tpu.core_type = #tpu.core_type<tc>, window_params = [{transform_indices = @transform_0, window_bounds = array<i64: 128, 16>}, {pipeline_mode = #tpu.pipeline_mode<synchronous>, transform_indices = @transform_1, window_bounds = array<i64: 10, 16>}, {pipeline_mode = #tpu.pipeline_mode<synchronous>, transform_indices = @transform_2, window_bounds = array<i64: 10, 1>}, {pipeline_mode = #tpu.pipeline_mode<synchronous>, transform_indices = @transform_3, window_bounds = array<i64: 10, 1>}, {pipeline_mode = #tpu.pipeline_mode<synchronous>, transform_indices = @transform_4, window_bounds = array<i64: 1, 1>}, {transform_indices = @transform_5, window_bounds = array<i64: 1, 128>}]} {
    %c0 = arith.constant 0 : index
    %c0_0 = arith.constant 0 : index
    %0 = vector.load %arg1[%c0, %c0_0] : memref<128x16xf32, #tpu.memory_space<vmem>>, vector<128x16xf32>
    %c0_1 = arith.constant 0 : index
    %c0_2 = arith.constant 0 : index
    %1 = vector.load %arg2[%c0_1, %c0_2] : memref<10x16xf32, #tpu.memory_space<vmem>>, vector<10x16xf32>
    %cst = arith.constant dense<0.000000e+00> : vector<10x128xf32>
    %2 = tpu.matmul %1, %0, %cst {dimension_numbers = #tpu.dot_dimension_numbers<[1], [1], [0], [0], [0, 0, 1, 0], [], []>} : vector<10x16xf32>, vector<128x16xf32>, vector<10x128xf32> -> vector<10x128xf32>
    %c0_3 = arith.constant 0 : index
    %c0_4 = arith.constant 0 : index
    %3 = vector.load %arg3[%c0_3, %c0_4] : memref<10x1xf32, #tpu.memory_space<vmem>>, vector<10x1xf32>
    %4 = vector.broadcast %3 : vector<10x1xf32> to vector<10x128xf32>
    %5 = arith.addf %2, %4 : vector<10x128xf32>
    %cst_5 = arith.constant 0.000000e+00 : f32
    %6 = vector.broadcast %cst_5 : f32 to vector<10x128xf32>
    %7 = arith.cmpf oge, %5, %6 : vector<10x128xf32>
    %cst_6 = arith.constant 0.00999999977 : f32
    %8 = vector.broadcast %cst_6 : f32 to vector<10x128xf32>
    %9 = arith.mulf %8, %5 : vector<10x128xf32>
    %10 = arith.select %7, %5, %9 : vector<10x128xi1>, vector<10x128xf32>
    %c0_7 = arith.constant 0 : index
    %c0_8 = arith.constant 0 : index
    %11 = vector.load %arg4[%c0_7, %c0_8] : memref<10x1xf32, #tpu.memory_space<vmem>>, vector<10x1xf32>
    %12 = vector.broadcast %11 : vector<10x1xf32> to vector<10x128xf32>
    %13 = arith.mulf %12, %10 : vector<10x128xf32>
    %cst_9 = arith.constant dense<0.000000e+00> : vector<128xf32>
    %14 = vector.multi_reduction <add>, %13, %cst_9 [0] : vector<10x128xf32> to vector<128xf32>
    %15 = vector.shape_cast %14 : vector<128xf32> to vector<1x128xf32>
    %c0_10 = arith.constant 0 : index
    %c0_11 = arith.constant 0 : index
    %16 = vector.load %arg5[%c0_10, %c0_11] : memref<1x1xf32, #tpu.memory_space<vmem>>, vector<1x1xf32>
    %17 = vector.broadcast %16 : vector<1x1xf32> to vector<1x128xf32>
    %18 = arith.addf %15, %17 : vector<1x128xf32>
    %19 = math.exp %18 : vector<1x128xf32>
    %c0_12 = arith.constant 0 : index
    %c0_13 = arith.constant 0 : index
    %20 = vector.load %arg6[%c0_12, %c0_13] : memref<1x128xf32, #tpu.memory_space<vmem>>, vector<1x128xf32>
    tpu.vector_store %arg6[%c0_12, %c0_13], %19 {strides = array<i32>} : memref<1x128xf32, #tpu.memory_space<vmem>>, vector<1x128xf32>,
    return
  }
  func.func @transform_0(%arg0: i32) -> (i32, i32) {
    %c0_i32 = arith.constant 0 : i32
    %c0_i32_0 = arith.constant 0 : i32
    return %arg0, %c0_i32 : i32, i32
  }
  func.func @transform_1(%arg0: i32) -> (i32, i32) {
    %c0_i32 = arith.constant 0 : i32
    %c0_i32_0 = arith.constant 0 : i32
    %c0_i32_1 = arith.constant 0 : i32
    return %c0_i32, %c0_i32_0 : i32, i32
  }
  func.func @transform_2(%arg0: i32) -> (i32, i32) {
    %c0_i32 = arith.constant 0 : i32
    %c0_i32_0 = arith.constant 0 : i32
    %c0_i32_1 = arith.constant 0 : i32
    return %c0_i32, %c0_i32_0 : i32, i32
  }
  func.func @transform_3(%arg0: i32) -> (i32, i32) {
    %c0_i32 = arith.constant 0 : i32
    %c0_i32_0 = arith.constant 0 : i32
    %c0_i32_1 = arith.constant 0 : i32
    return %c0_i32, %c0_i32_0 : i32, i32
  }
  func.func @transform_4(%arg0: i32) -> (i32, i32) {
    %c0_i32 = arith.constant 0 : i32
    %c0_i32_0 = arith.constant 0 : i32
    %c0_i32_1 = arith.constant 0 : i32
    return %c0_i32, %c0_i32_0 : i32, i32
  }
  func.func @transform_5(%arg0: i32) -> (i32, i32) {
    %c0_i32 = arith.constant 0 : i32
    %c0_i32_0 = arith.constant 0 : i32
    return %c0_i32, %arg0 : i32, i32
  }
}

</mosaic_0001>

<bundles_post_ra>
// kernel: tpu_custom_call.1
= control target key start
LH: loop header
LB: loop body
LE: loop exit
PB: predicated region body
PF: predicated region fallthrough
CT: control target
= control target key end

     0   :  { %s781_s0 = inlined_call_operand.vmem [shape: f32[256,16], index: 0, kind: input, shape index: {}]   ;;  %s782_s1 = inlined_call_operand.vmem [shape: f32[10,16], index: 1, kind: input, shape index: {}]   ;;  %s783_s2 = inlined_call_operand.vmem [shape: f32[10,1], index: 2, kind: input, shape index: {}]   ;;  %s784_s3 = inlined_call_operand.vmem [shape: f32[10,1], index: 3, kind: input, shape index: {}]   ;;  %s785_s4 = inlined_call_operand.<no memory space> [shape: f32[1,1], index: 4, kind: input, shape index: {}]   ;;  %s786_s5 = inlined_call_operand.hbm [shape: f32[1,256], index: 5, kind: output, shape index: {}]  }
   0x1   :  { %v10_v0 = vstv %s785_s4 }
   0x2   :  { %11 = vst [vmem:[#allocation2] sm:$0x1] %v10_v0 }
   0x3   :  { %12 = vsyncpa [#allocation4], 0 }
   0x4   :  { %14 = vsyncpa [#allocation4 + $0x1], 0  ;;  %s627_s20 = smov 0   ;;  %s629_s21 = smov 0  }
   0x5   :  { %s631_s22 = smov 0   ;;  %s633_s23 = smov 0  }
   0x6 LB: > { %s648_s4 = sadd.s32 4294967295, %s591_s23   ;;  %s442_s24 = sadd.s32 4294967294, %s591_s23   ;;  %s591_s23 = sphi %s633_s23, %s792_s23   ;;  %s587_s22 = sphi %s631_s22, %s791_s22   ;;  %s583_s21 = sphi %s629_s21, %s790_s21   ;;  %s579_s20 = sphi %s627_s20, %s789_s20  }
   0x7   : > { %s652_s25 = sadd.s32 1, %s591_s23   ;;  %s137_s26 = sadd.s32 1, %s587_s22 }
   0x8   : > { %s134_s27 = ssub.s32 %s591_s23, %s652_s25  ;;  %p147_p0 = scmp.ne.s32.totalorder %s587_s22, %s583_s21 }
   0x9   : > { %p135_p1 = scmp.eq.s32.totalorder %s134_s27, 0  ;;  %p148_p2 = scmp.eq.s32.totalorder %s648_s4, 1 }
   0xa   : > { %p153_p3 = scmp.ne.s32.totalorder %s583_s21, %s579_s20  ;;  %p154_p4 = scmp.eq.s32.totalorder %s442_s24, 1 }
   0xb   : > { %s663_s28 = scalar_select %p135_p1, %s587_s22, %s137_s26  }
   0xc   : > { %p665_p5 = por %p148_p2, %p147_p0  ;;  %p669_p6 = por %p154_p4, %p153_p3 }
   0xd   : > { %p445_p7 = scmp.ge.s32.totalorder %s591_s23, 1  ;;  %p193_p8 = scmp.lt.s32.totalorder %s591_s23, 3 }
   0xf   : > { %p194_p9 = pnand %p445_p7, %p193_p8 }
  0x10   : > { %s446_s6 = sshll.u32 (!%p194_p9), %s648_s4, 4  ;;  %s383_s9 = scalar_lea.hbm (!%p194_p9), %s786_s5, %s648_s4 }
  0x11   : > { %197 = sbr.rel (%p194_p9) target bundleno = 251 (0xfb), region = 40  ;;  %p221_p10 = scmp.lt.s32.totalorder (!%p194_p9), %s446_s6, 31 }
  0x12   : > { %s387_s12 = sshll.u32 (!%p194_p9), %s383_s9, 4  ;;  %s549_s4 = scalar_lea.hbm (!%p194_p9), %s786_s5, 2  ;;  %s388_s12 = int_to_ptr.hbm [resolvable:$true] %s387_s12 }
  0x13   : > { %s543_s14 = sshra.s32 (!%p194_p9), %s388_s12, 4  ;;  %s544_s14 = int_to_ptr.hbm [resolvable:$true] %s543_s14 }
  0x14   : > { %s545_s15 = scalar_lea.hbm (!%p194_p9), %s544_s14, 1  ;;  %p550_p0 = scmp.lt.s32.totalorder (!%p194_p9), %s544_s14, %s786_s5 }
  0x15   : > { %p546_p11 = scmp.ne.s32.totalorder (!%p194_p9), %s544_s14, %s545_s15  ;;  %p551_p1 = scmp.lt.s32.totalorder (!%p194_p9), %s549_s4, %s545_s15 }
  0x16   : > { %s794_s6 = smov (!%p221_p10, %s446_s6), 31  ;;  %vm256_vm0 = vcmask 130048   ;;  %v245_v8 = vld [vmem:[%s783_s2 + $0x8] sm:$0x3]  ;;  %v593_v10 = vmov 0   ;;  %v244_v13 = vld [vmem:[%s783_s2] sm:$0xff] }
  0x17   : > { %s447_s7 = sshll.u32 %s794_s6, 3  ;;  %524 = vset.pattern.permute.xlu0 %v593_v10  ;;  %525 = vset.pattern.permute.xlu1 %v593_v10  ;;  %v341_v12 = vld [vmem:[%s784_s3 + $0x8] sm:$0x3]  ;;  %v363_v14 = vld [vmem:[#allocation2] sm:$0x1]  ;;  %vm354_vm3 = vcmask 1041408   ;;  %p547_p12 = pnand %p546_p11, %p665_p5 }
  0x18   : > { %s679_s10 = scalar_lea.vmem %s781_s0, %s447_s7  ;;  %253 = vperm.xlu0 %524, %v245_v8   ;;  %526 = vset.pattern.permute.xlu2 %v593_v10  ;;  %v340_v17 = vld [vmem:[%s784_s3] sm:$0xff]  ;;  %v243_v24 = vld [vmem:[%s782_s1 + $0x8] sm:$0x3]  ;;  %s218_s6 = sand.u32 1, %s583_s21  }
  0x19   : > { %v241_v1 = vld [vmem:[%s679_s10 + $0x78] sm:$0xff]  ;;  %v240_v2 = vld [vmem:[%s679_s10 + $0x70] sm:$0xff]  ;;  %v239_v3 = vld [vmem:[%s679_s10 + $0x68] sm:$0xff]  ;;  %349 = vperm.xlu1 %525, %v341_v12   ;;  %366 = vperm.xlu2 %526, %v363_v14   ;;  %s375_s13 = scalar_lea.sflag [#allocation4], %s218_s6  ;;  %p548_p13 = pneg %p547_p12 }
  0x1a   : > { %448 = vmatpush.xpose.msk.msra.mxu0 %vm256_vm0, %v241_v1  ;;  %468 = vmatpush.xpose.msk.msra.mxu1 %vm256_vm0, %v241_v1  ;;  %v238_v4 = vld [vmem:[%s679_s10 + $0x60] sm:$0xff]  ;;  %v237_v5 = vld [vmem:[%s679_s10 + $0x58] sm:$0xff]  ;;  %v236_v6 = vld [vmem:[%s679_s10 + $0x50] sm:$0xff]  ;;  %p552_p2 = por %p551_p1, %p550_p0 }
  0x1b   : > { %v235_v7 = vld [vmem:[%s679_s10 + $0x48] sm:$0xff]  ;;  %v234_v9 = vld [vmem:[%s679_s10 + $0x40] sm:$0xff]  ;;  %v233_v11 = vld [vmem:[%s679_s10 + $0x38] sm:$0xff] }
  0x1c   : > { %v232_v15 = vld [vmem:[%s679_s10 + $0x30] sm:$0xff]  ;;  %v231_v16 = vld [vmem:[%s679_s10 + $0x28] sm:$0xff]  ;;  %v230_v18 = vld [vmem:[%s679_s10 + $0x20] sm:$0xff]  ;;  %p553_p3 = pnand %p552_p2, %p548_p13 }
  0x1d   : > { %v229_v19 = vld [vmem:[%s679_s10 + $0x18] sm:$0xff]  ;;  %v228_v20 = vld [vmem:[%s679_s10 + $0x10] sm:$0xff]  ;;  %v227_v21 = vld [vmem:[%s679_s10 + $0x8] sm:$0xff] }
  0x1e   : > { %449 = vmatpush.xpose.msk.msra.mxu0 %vm256_vm0, %v240_v2  ;;  %469 = vmatpush.xpose.msk.msra.mxu1 %vm256_vm0, %v240_v2  ;;  %v226_v22 = vld [vmem:[%s679_s10] sm:$0xff]  ;;  %s219_s10 = scalar_lea.vmem [#allocation3], %s218_s6 }
  0x1f   : > { %v242_v23 = vld [vmem:[%s782_s1] sm:$0xff]  ;;  %s385_s11 = sshll.u32 %s219_s10, 4  ;;  %s386_s11 = int_to_ptr.vmem [resolvable:$true] %s385_s11 }
  0x20   : > { %248 = vperm.xlu0 %524, %v244_v13  }
  0x21   : > { %344 = vperm.xlu1 %525, %v340_v17  }
  0x22   : > { %450 = vmatpush.xpose.msk.msra.mxu0 %vm256_vm0, %v239_v3  ;;  %470 = vmatpush.xpose.msk.msra.mxu1 %vm256_vm0, %v239_v3 }
  0x26   : > { %451 = vmatpush.xpose.msk.msra.mxu0 %vm256_vm0, %v238_v4  ;;  %471 = vmatpush.xpose.msk.msra.mxu1 %vm256_vm0, %v238_v4 }
  0x2a   : > { %452 = vmatpush.xpose.msk.msra.mxu0 %vm256_vm0, %v237_v5  ;;  %472 = vmatpush.xpose.msk.msra.mxu1 %vm256_vm0, %v237_v5 }
  0x2e   : > { %453 = vmatpush.xpose.msk.msra.mxu0 %vm256_vm0, %v236_v6  ;;  %473 = vmatpush.xpose.msk.msra.mxu1 %vm256_vm0, %v236_v6 }
  0x32   : > { %454 = vmatpush.xpose.msk.msra.mxu0 %vm256_vm0, %v235_v7  ;;  %474 = vmatpush.xpose.msk.msra.mxu1 %vm256_vm0, %v235_v7 }
  0x36   : > { %455 = vmatpush.xpose.msk.msra.mxu0 %vm256_vm0, %v234_v9  ;;  %475 = vmatpush.xpose.msk.msra.mxu1 %vm256_vm0, %v234_v9 }
  0x3a   : > { %456 = vmatpush.xpose.msk.msra.mxu0 %vm256_vm0, %v233_v11  ;;  %476 = vmatpush.xpose.msk.msra.mxu1 %vm256_vm0, %v233_v11 }
  0x3e   : > { %457 = vmatpush.xpose.msk.msra.mxu0 %vm256_vm0, %v232_v15  ;;  %477 = vmatpush.xpose.msk.msra.mxu1 %vm256_vm0, %v232_v15 }
  0x42   : > { %458 = vmatpush.xpose.msk.msra.mxu0 %vm256_vm0, %v231_v16  ;;  %478 = vmatpush.xpose.msk.msra.mxu1 %vm256_vm0, %v231_v16 }
  0x46   : > { %459 = vmatpush.xpose.msk.msra.mxu0 %vm256_vm0, %v230_v18  ;;  %479 = vmatpush.xpose.msk.msra.mxu1 %vm256_vm0, %v230_v18 }
  0x4a   : > { %460 = vmatpush.xpose.msk.msra.mxu0 %vm256_vm0, %v229_v19  ;;  %480 = vmatpush.xpose.msk.msra.mxu1 %vm256_vm0, %v229_v19 }
  0x4e   : > { %461 = vmatpush.xpose.msk.msra.mxu0 %vm256_vm0, %v228_v20  ;;  %481 = vmatpush.xpose.msk.msra.mxu1 %vm256_vm0, %v228_v20 }
  0x52   : > { %462 = vmatpush.xpose.msk.msra.mxu0 %vm256_vm0, %v227_v21  ;;  %482 = vmatpush.xpose.msk.msra.mxu1 %vm256_vm0, %v227_v21 }
  0x56   : > { %463 = vmatpush.xpose.msk.msra.mxu0 %vm256_vm0, %v226_v22  ;;  %483 = vmatpush.xpose.msk.msra.mxu1 %vm256_vm0, %v226_v22 }
  0x59   : > { %464 = vmatmul.msk.f32.vlgmr.msra.gmra.mxu0 %vm256_vm0, %v242_v23  ;;  %465 = vmatmul.msk.f32.vlgmr.msra.gmra.mxu1 %vm256_vm0, %v243_v24 }
  0x73   : > { %v367_v44 = vpop.permute.xlu2 %366 }
  0x74   : > { %v369_v47 = vperm.slane %v367_v44, 0 }
  0x8a   : > { %v254_v25 = vpop.permute.xlu0 %253 }
  0x8b   : > { %v350_v26 = vpop.permute.xlu1 %349 }
  0x92   : > { %v249_v27 = vpop.permute.xlu0 %248 }
  0x93   : > { %v345_v34 = vpop.permute.xlu1 %344 }
  0xd6   : > { %v328_v28 = vpop.f32.mrf.mxu0  ;;  %v331_v29 = vpop.f32.mrf.mxu1 }
  0xd7   : > { %v329_v30 = vadd.f32 %v328_v28, %v249_v27  ;;  %v332_v31 = vadd.f32 %v331_v29, %v254_v25 }
  0xd9   : > { %vm334_vm1 = vcmp.ge.f32.partialorder %v329_v30, 0.0  ;;  %v336_v32 = vmul.f32 0.01, %v329_v30  ;;  %vm335_vm2 = vcmp.ge.f32.partialorder %v332_v31, 0.0  ;;  %v337_v33 = vmul.f32 0.01, %v332_v31 }
  0xdb   : > { %v338_v35 = vsel %vm334_vm1, %v329_v30, %v336_v32  ;;  %v339_v36 = vsel %vm335_vm2, %v332_v31, %v337_v33 }
  0xdc   : > { %v352_v37 = vmul.f32 %v345_v34, %v338_v35  ;;  %v353_v38 = vmul.f32 %v350_v26, %v339_v36 }
  0xde   : > { %v355_v39 = vsel %vm354_vm3, %v353_v38, 0.0 }
  0xdf   : > { %v356_v40 = vadd.f32 %v355_v39, %v352_v37 }
  0xe1   : > { %v357_v41 = vrot.slane %v356_v40, 4 }
  0xe3   : > { %v358_v42 = vadd.f32 %v357_v41, %v356_v40 }
  0xe5   : > { %v359_v43 = vrot.slane %v358_v42, 2 }
  0xe7   : > { %v360_v45 = vadd.f32 %v359_v43, %v358_v42 }
  0xe9   : > { %v361_v46 = vrot.slane %v360_v45, 1 }
  0xeb   : > { %v362_v48 = vadd.f32 %v361_v46, %v360_v45 }
  0xed   : > { %v370_v49 = vadd.f32 %v369_v47, %v362_v48 }
  0xef   : > { %v371_v50 = vmul.f32 1.442695, %v370_v49 }
  0xf1   : > { %527 = vpow2.f32 %v371_v50 }
  0xf7   : > { %v528_v51 = vpop.eup %527 }
  0xf8   : > { %373 = vst [vmem:[%s219_s10] sm:$0x1] %v528_v51 }
  0xf9   : > { %556 = shalt.err (!%p553_p3)
}
  0xfa   : > { %484 = dma.vmem_to_hbm [thread:$0]  (%p665_p5), %s386_s11, 16, %s388_s12, %s375_s13  }
  0xfb PF: > { %p490_p4 = scmp.ge.s32.totalorder %s591_s23, 2  ;;  %s399_s24 = sand.u32 1, %s579_s20  }
  0xfc   : > { %s400_s26 = scalar_lea.sflag [#allocation4], %s399_s24 }
  0xfd   : > { %p487_p7 = pnand %p490_p4, %p669_p6 }
  0xff   : > { %p488_p8 = pneg %p487_p7 }
 0x101   : > { %574 = dma.done.wait (%p488_p8), %s400_s26, 16  }
 0x102   : > { %576 = vsyncadd (%p488_p8), %s400_s26, 4294967280  ;;  %p17_p9 = scmp.ge.s32.totalorder %s652_s25, 4   ;;  %s789_s20 = smov %s583_s21 }
 0x103   : > { %s790_s21 = smov %s587_s22  ;;  %s791_s22 = smov %s663_s28 }
 0x104   : > { %s792_s23 = smov %s652_s25  ;;  %19 = sbr.rel (!%p17_p9) target bundleno = 6 (0x6), region = 75 }
 0x109   :  { %405 = vsyncpa [#allocation4], 1 }
 0x10a   :  { %407 = vsyncpa [#allocation4 + $0x1], 1 }

</bundles_post_ra>
